<compile_context>
chip_gen: v7x
topology: tpu7x:2x2x1
jax: 0.10.0
libtpu: 0.0.40
codegen_flags: <defaults>
</compile_context>

<pallas_src>
import functools

import jax
import jax.numpy as jnp
from jax.experimental import pallas as pl
from jax.experimental.pallas import tpu as pltpu

_EPS = 1e-12                       # F.normalize default eps
_FUSE_MAX_BYTES = 32 * 1024 * 1024  # fuse support/query launches below this


# --------------------------------------------------------------------------
# Small host-side helpers
# --------------------------------------------------------------------------
def _cdiv(a: int, b: int) -> int:
    return -(-a // b)


def _round_up(v: int, m: int) -> int:
    return _cdiv(v, m) * m


def _round_down(v: int, m: int) -> int:
    return (v // m) * m


def _sublane_multiple(dtype) -> int:
    # f32 -> 8 rows/sublane-group, bf16 -> 16, int8/fp8 -> 32.
    return max(8, 32 // jnp.dtype(dtype).itemsize)


def _vmem_capacity_bytes() -> int:
    try:
        cap = int(getattr(pltpu.get_tpu_info(), "vmem_capacity_bytes"))
        if cap > 0:
            return cap
    except Exception:
        pass
    return 128 * 1024 * 1024  # v5e/v6e-sized default assumption


def _target_block_bytes(vmem_bytes: int) -> int:
    # Conservative ~2 MiB on 64 MiB-VMEM parts (v7x), ~4 MiB on 128 MiB parts.
    return (2 << 20) if vmem_bytes <= (64 << 20) else (4 << 20)


def _compiler_params(block_bytes: int, vmem_bytes: int, semantics):
    # in + out, double-buffered, plus headroom for compiler-internal scratch.
    limit = max(32 << 20, 4 * block_bytes + (8 << 20))
    limit = min(limit, (vmem_bytes * 3) // 4)
    return pltpu.CompilerParams(dimension_semantics=semantics,
                                vmem_limit_bytes=int(limit))


# --------------------------------------------------------------------------
# Kernel bodies
# --------------------------------------------------------------------------
def _lp_inverse_norm(x_f32, p: float, axis: int):
    """1 / max(||x||_p, eps) reduced along `axis` (keepdims=True)."""
    if p == 2.0:
        sumsq = jnp.sum(x_f32 * x_f32, axis=axis, keepdims=True)
        # max(sqrt(ss), eps) == sqrt(max(ss, eps^2)); eps^2=1e-24 is a normal f32.
        return jax.lax.rsqrt(jnp.maximum(sumsq, jnp.float32(_EPS * _EPS)))
    if p == 1.0:
        norm = jnp.sum(jnp.abs(x_f32), axis=axis, keepdims=True)
    elif float(p).is_integer() and 0.0 < p <= 8.0:
        # Small integer p: repeated multiplies instead of exp(p*log|x|).
        absx = jnp.abs(x_f32)
        powd = absx
        for _ in range(int(p) - 1):
            powd = powd * absx
        norm = jnp.sum(powd, axis=axis, keepdims=True) ** jnp.float32(1.0 / p)
    else:
        # Truly fractional p: generic pow (EUP-heavy, rare).
        norm = jnp.sum(jnp.abs(x_f32) ** jnp.float32(p),
                       axis=axis, keepdims=True) ** jnp.float32(1.0 / p)
    return 1.0 / jnp.maximum(norm, jnp.float32(_EPS))


def _normalize_kernel(x_ref, o_ref, *, p: float, axis: int):
    x = x_ref[...].astype(jnp.float32)
    inv = _lp_inverse_norm(x, p, axis=axis)
    o_ref[...] = (x * inv).astype(o_ref.dtype)


# --------------------------------------------------------------------------
# Wrappers
# --------------------------------------------------------------------------
def _normalize_2d_xla(x: jax.Array, p: float) -> jax.Array:
    # Tiny feature dim (< 128 lanes): a single fused XLA elementwise+reduce
    # pass matches/beats a lane-sparse Pallas launch for these shapes.
    xf = x.astype(jnp.float32)
    inv = _lp_inverse_norm(xf, p, axis=1)
    return (xf * inv).astype(x.dtype)


def _normalize_2d(x: jax.Array, p: float) -> jax.Array:
    """Lane-dense path for [N, C] features with C >= 128 (reduce over lanes)."""
    n, c = x.shape
    itemsize = jnp.dtype(x.dtype).itemsize
    sub = _sublane_multiple(x.dtype)
    vmem = _vmem_capacity_bytes()
    budget = _target_block_bytes(vmem)

    c_pad = _round_up(c, 128)
    tn = max(sub, _round_down(budget // (c_pad * itemsize), sub))
    if tn >= n:
        tn = n
        if n > sub:  # guarantee >= 2 parallel grid steps (v7x megacore)
            cand = _round_up(_cdiv(n, 2), sub)
            if cand < n:
                tn = cand
    blk_bytes = _round_up(tn, sub) * c_pad * itemsize

    kernel = functools.partial(_normalize_kernel, p=p, axis=1)
    return pl.pallas_call(
        kernel,
        out_shape=jax.ShapeDtypeStruct((n, c), x.dtype),
        grid_spec=pltpu.PrefetchScalarGridSpec(
            num_scalar_prefetch=0,
            grid=(_cdiv(n, tn),),
            in_specs=[pl.BlockSpec((tn, c), lambda i: (i, 0))],
            out_specs=pl.BlockSpec((tn, c), lambda i: (i, 0)),
        ),
        compiler_params=_compiler_params(blk_bytes, vmem, ("parallel",)),
        cost_estimate=pl.CostEstimate(
            flops=3 * n * c,
            transcendentals=n,
            bytes_accessed=2 * n * c * itemsize),
    )(x)


def _normalize_ncs(x: jax.Array, p: float) -> jax.Array:
    """Path for [N, C, *spatial] features (reduction over C)."""
    orig_shape = x.shape
    n, c = orig_shape[0], orig_shape[1]
    s = 1
    for d in orig_shape[2:]:
        s *= d
    x3 = x.reshape(n, c, s)
    itemsize = jnp.dtype(x.dtype).itemsize
    sub = _sublane_multiple(x.dtype)
    vmem = _vmem_capacity_bytes()
    budget = _target_block_bytes(vmem)

    if s < 128 and c >= 128:
        # Lane-dense channels-last path (common CNN tails: 7x7, 14x14 maps):
        # block (TB, S, C), reduce over the lane (C) axis. Avoids masked vst
        # on a <128-wide last dim; transpose is cheap layout plumbing here.
        xt = jnp.transpose(x3, (0, 2, 1))                      # (N, S, C)
        per_sample = _round_up(s, sub) * _round_up(c, 128) * itemsize
        tb = max(1, budget // per_sample)
        tb = min(tb, n)
        if _cdiv(n, tb) < 2 and n >= 2:
            tb = _cdiv(n, 2)       # >= 2 parallel grid steps (v7x megacore)
        blk_bytes = tb * per_sample
        kernel = functools.partial(_normalize_kernel, p=p, axis=2)
        out = pl.pallas_call(
            kernel,
            out_shape=jax.ShapeDtypeStruct((n, s, c), x.dtype),
            grid_spec=pltpu.PrefetchScalarGridSpec(
                num_scalar_prefetch=0,
                grid=(_cdiv(n, tb),),
                in_specs=[pl.BlockSpec((tb, s, c), lambda i: (i, 0, 0))],
                out_specs=pl.BlockSpec((tb, s, c), lambda i: (i, 0, 0)),
            ),
            compiler_params=_compiler_params(blk_bytes, vmem, ("parallel",)),
            cost_estimate=pl.CostEstimate(
                flops=3 * n * c * s,
                transcendentals=n * s,
                bytes_accessed=2 * n * c * s * itemsize),
        )(xt)
        return jnp.transpose(out, (0, 2, 1)).reshape(orig_shape)

    # Channels-second layout: block (TB, C, TS), reduce over the sublane (C)
    # axis. TS is always a multiple of 128 when S >= 128 (dense stores).
    c_pad = _round_up(c, sub)
    if s >= 128:
        ts = max(128, _round_down(budget // (c_pad * itemsize), 128))
        ts = min(ts, s if s % 128 == 0 else _round_down(s, 128))
    else:
        # Tiny map AND tiny C: full-extent trailing dims (legal); lanes are
        # sparse either way for such shapes.
        ts = s
    ts_pad = _round_up(ts, 128)
    per_sample = c_pad * ts_pad * itemsize
    tb = max(1, budget // per_sample)
    tb = min(tb, n)
    if _cdiv(n, tb) * _cdiv(s, ts) < 2 and n >= 2:
        tb = _cdiv(n, 2)           # >= 2 parallel grid steps (v7x megacore)
    blk_bytes = tb * per_sample

    kernel = functools.partial(_normalize_kernel, p=p, axis=1)
    out = pl.pallas_call(
        kernel,
        out_shape=jax.ShapeDtypeStruct((n, c, s), x.dtype),
        grid_spec=pltpu.PrefetchScalarGridSpec(
            num_scalar_prefetch=0,
            grid=(_cdiv(n, tb), _cdiv(s, ts)),
            in_specs=[pl.BlockSpec((tb, c, ts), lambda bi, si: (bi, 0, si))],
            out_specs=pl.BlockSpec((tb, c, ts), lambda bi, si: (bi, 0, si)),
        ),
        compiler_params=_compiler_params(blk_bytes, vmem,
                                         ("parallel", "parallel")),
        cost_estimate=pl.CostEstimate(
            flops=3 * n * c * s,
            transcendentals=n * s,
            bytes_accessed=2 * n * c * s * itemsize),
    )(x3)
    return out.reshape(orig_shape)


def _normalize_one(x: jax.Array, p: float) -> jax.Array:
    """F.normalize(x, dim=1, p=p) semantics."""
    if x.ndim < 2:
        raise ValueError("Normalize expects inputs with at least 2 dims [N, C, *].")
    if x.ndim == 2:
        if x.shape[1] < 128:
            return _normalize_2d_xla(x, p)
        return _normalize_2d(x, p)
    return _normalize_ncs(x, p)


class NormalizePallas:
    """JAX/Pallas equivalent of the PyTorch `Normalize` feature transformer."""

    def __init__(self, norm: float = 2.0):
        self.norm = float(norm)

    def __call__(self, support_features: jax.Array, query_features: jax.Array):
        s, q = support_features, query_features
        # Fuse the two launches when shapes allow and the tensors are small
        # enough that launch/ramp overhead dominates the concat copy.
        total_bytes = (s.size * jnp.dtype(s.dtype).itemsize
                       + q.size * jnp.dtype(q.dtype).itemsize)
        if (s.ndim == q.ndim and s.shape[1:] == q.shape[1:]
                and s.dtype == q.dtype and total_bytes <= _FUSE_MAX_BYTES):
            ns = s.shape[0]
            fused = jnp.concatenate([s, q], axis=0)
            out = _normalize_one(fused, self.norm)
            return out[:ns], out[ns:]
        return _normalize_one(s, self.norm), _normalize_one(q, self.norm)


# --------------------------------------------------------------------------
# Reference + self-test
# --------------------------------------------------------------------------
def _reference_normalize(x: jax.Array, p: float) -> jax.Array:
    xf = x.astype(jnp.float32)
    if p == 2.0:
        norm = jnp.sqrt(jnp.sum(xf * xf, axis=1, keepdims=True))
    else:
        norm = jnp.sum(jnp.abs(xf) ** p, axis=1, keepdims=True) ** (1.0 / p)
    return (xf / jnp.maximum(norm, _EPS)).astype(x.dtype)


if __name__ == "__main__":
    key = jax.random.PRNGKey(0)
    keys = jax.random.split(key, 8)

    transform = NormalizePallas(norm=2.0)

    # 1) [N, hidden_dim, H, W] feature maps (NCHW) -> fused NCS Pallas path.
    support = jax.random.normal(keys[0], (2, 4, 16, 16), dtype=jnp.float32)
    query = jax.random.normal(keys[1], (3, 4, 16, 16), dtype=jnp.float32)
    sup_out, qry_out = transform(support, query)
    jax.block_until_ready((sup_out, qry_out))
    assert sup_out.shape == support.shape and qry_out.shape == query.shape
    assert jnp.allclose(sup_out, _reference_normalize(support, 2.0), atol=1e-6, rtol=1e-6)
    assert jnp.allclose(qry_out, _reference_normalize(query, 2.0), atol=1e-6, rtol=1e-6)

    # 2) [N, hidden_dim] vectors with C >= 128 -> lane-dense 2-D Pallas path.
    sup2 = jax.random.normal(keys[2], (6, 256), dtype=jnp.float32)
    qry2 = jax.random.normal(keys[3], (5, 256), dtype=jnp.float32)
    s2, q2 = transform(sup2, qry2)
    jax.block_until_ready((s2, q2))
    assert jnp.allclose(s2, _reference_normalize(sup2, 2.0), atol=1e-6, rtol=1e-6)
    assert jnp.allclose(q2, _reference_normalize(qry2, 2.0), atol=1e-6, rtol=1e-6)

    # 3) Tiny 2-D feature dim (C=32 < 128) -> fused XLA fallback (per review).
    sup3 = jax.random.normal(keys[4], (6, 32), dtype=jnp.float32)
    qry3 = jax.random.normal(keys[5], (5, 32), dtype=jnp.float32)
    s3, q3 = transform(sup3, qry3)
    jax.block_until_ready((s3, q3))
    assert jnp.allclose(s3, _reference_normalize(sup3, 2.0), atol=1e-6, rtol=1e-6)
    assert jnp.allclose(q3, _reference_normalize(qry3, 2.0), atol=1e-6, rtol=1e-6)

    # 4) Small spatial (7x7), wide channels -> lane-dense channels-last path.
    sup4 = jax.random.normal(keys[6], (2, 128, 7, 7), dtype=jnp.float32)
    qry4 = jax.random.normal(keys[7], (3, 128, 7, 7), dtype=jnp.float32)
    s4, q4 = transform(sup4, qry4)
    jax.block_until_ready((s4, q4))
    assert jnp.allclose(s4, _reference_normalize(sup4, 2.0), atol=1e-6, rtol=1e-6)
    assert jnp.allclose(q4, _reference_normalize(qry4, 2.0), atol=1e-6, rtol=1e-6)

    # 5) L1-norm path (non-p=2 branch without generic pow).
    transform_l1 = NormalizePallas(norm=1.0)
    s1, q1 = transform_l1(support, query)
    jax.block_until_ready((s1, q1))
    assert jnp.allclose(s1, _reference_normalize(support, 1.0), atol=1e-6, rtol=1e-6)
    assert jnp.allclose(q1, _reference_normalize(query, 1.0), atol=1e-6, rtol=1e-6)

    print("KERNEL_OK")
</pallas_src>

<mosaic_0001>
module attributes {stable_mosaic.version = 11 : i64} {
  func.func @_normalize_kernel(%arg0: i32, %arg1: i32, %arg2: memref<3x4x256xf32, #tpu.memory_space<vmem>>, %arg3: memref<3x4x256xf32, #tpu.memory_space<vmem>>) attributes {dimension_semantics = [#tpu.dimension_semantics<parallel>, #tpu.dimension_semantics<parallel>], iteration_bounds = array<i64: 2, 1>, scalar_prefetch = 0 : i64, scratch_operands = 0 : i64, tpu.core_type = #tpu.core_type<tc>, window_params = [{transform_indices = @transform_0, window_bounds = array<i64: 3, 4, 256>}, {transform_indices = @transform_1, window_bounds = array<i64: 3, 4, 256>}]} {
    %c0 = arith.constant 0 : index
    %c0_0 = arith.constant 0 : index
    %c0_1 = arith.constant 0 : index
    %0 = vector.load %arg2[%c0, %c0_0, %c0_1] : memref<3x4x256xf32, #tpu.memory_space<vmem>>, vector<3x4x256xf32>
    %1 = arith.mulf %0, %0 : vector<3x4x256xf32>
    %cst = arith.constant dense<0.000000e+00> : vector<3x256xf32>
    %2 = vector.multi_reduction <add>, %1, %cst [1] : vector<3x4x256xf32> to vector<3x256xf32>
    %3 = vector.shape_cast %2 : vector<3x256xf32> to vector<3x1x256xf32>
    %cst_2 = arith.constant 1.000000e-24 : f32
    %4 = vector.broadcast %cst_2 : f32 to vector<3x1x256xf32>
    %5 = arith.maximumf %3, %4 : vector<3x1x256xf32>
    %6 = math.rsqrt %5 : vector<3x1x256xf32>
    %7 = vector.broadcast %6 : vector<3x1x256xf32> to vector<3x4x256xf32>
    %8 = arith.mulf %0, %7 : vector<3x4x256xf32>
    %c0_3 = arith.constant 0 : index
    %c0_4 = arith.constant 0 : index
    %c0_5 = arith.constant 0 : index
    %9 = vector.load %arg3[%c0_3, %c0_4, %c0_5] : memref<3x4x256xf32, #tpu.memory_space<vmem>>, vector<3x4x256xf32>
    tpu.vector_store %arg3[%c0_3, %c0_4, %c0_5], %8 {strides = array<i32>} : memref<3x4x256xf32, #tpu.memory_space<vmem>>, vector<3x4x256xf32>,
    return
  }
  func.func @transform_0(%arg0: i32, %arg1: i32) -> (i32, i32, i32) {
    %c0_i32 = arith.constant 0 : i32
    %c0_i32_0 = arith.constant 0 : i32
    return %arg0, %c0_i32, %arg1 : i32, i32, i32
  }
  func.func @transform_1(%arg0: i32, %arg1: i32) -> (i32, i32, i32) {
    %c0_i32 = arith.constant 0 : i32
    %c0_i32_0 = arith.constant 0 : i32
    return %arg0, %c0_i32, %arg1 : i32, i32, i32
  }
}

</mosaic_0001>

<bundles_post_ra>
// kernel: tpu_custom_call.1
= control target key start
LH: loop header
LB: loop body
LE: loop exit
PB: predicated region body
PF: predicated region fallthrough
CT: control target
= control target key end

     0   :  { %6 = vsyncpa [#allocation3], 0  ;;  %s810_s0 = inlined_call_operand.hbm [shape: f32[5,4,256], index: 0, kind: input, shape index: {}]   ;;  %s811_s1 = inlined_call_operand.hbm [shape: f32[5,4,256], index: 1, kind: output, shape index: {}]  }
   0x1   :  { %8 = vsyncpa [#allocation3 + $0x1], 0 }
   0x2   :  { %9 = vsyncpa [#allocation4], 0 }
   0x3   :  { %11 = vsyncpa [#allocation4 + $0x1], 0  ;;  %s604_s6 = smov 0   ;;  %s606_s7 = smov 0  }
   0x4   :  { %s608_s8 = smov 0   ;;  %s610_s9 = smov 0  }
   0x5   :  { %s612_s10 = smov 0   ;;  %s614_s11 = smov 0  }
   0x6 LB: > { %s374_s12 = sadd.s32 4294967295, %s586_s11   ;;  %s375_s13 = sadd.s32 4294967294, %s586_s11   ;;  %s586_s11 = sphi %s614_s11, %s17_s11   ;;  %s582_s10 = sphi %s612_s10, %s822_s10   ;;  %s578_s9 = sphi %s610_s9, %s821_s9   ;;  %s574_s8 = sphi %s608_s8, %s820_s8   ;;  %s570_s7 = sphi %s606_s7, %s819_s7   ;;  %s566_s6 = sphi %s604_s6, %s818_s6  }
   0x7   : > { %s29_s14 = sadd.s32 1, %s582_s10  ;;  %s38_s15 = sadd.s32 1, %s574_s8 }
   0x8   : > { %p31_p0 = scmp.ge.s32.totalorder %s29_s14, 2  ;;  %p45_p1 = scmp.ne.s32.totalorder %s574_s8, %s570_s7 }
   0x9   : > { %p46_p2 = scmp.eq.s32.totalorder %s586_s11, 0  ;;  %p51_p3 = scmp.ne.s32.totalorder %s570_s7, %s566_s6 }
   0xa   : > { %s824_s14 = smov (%p31_p0, %s29_s14), 0  ;;  %p52_p5 = scmp.eq.s32.totalorder %s374_s12, 0 }
   0xb   : > { %p47_p4 = por %p46_p2, %p45_p1  ;;  %s33_s16 = ssub.s32 %s582_s10, %s824_s14 }
   0xc   : > { %p77_p6 = scmp.eq.s32.totalorder %s374_s12, 1  ;;  %p36_p7 = scmp.eq.s32.totalorder %s33_s16, 0 }
   0xd   : > { %p647_p8 = por %p52_p5, %p51_p3  ;;  %p83_p10 = scmp.eq.s32.totalorder %s375_s13, 1 }
   0xe   : > { %p651_p9 = por %p77_p6, %p45_p1  ;;  %p812_p12 = scmp.ge.s32.totalorder %s586_s11, 2 }
   0xf   : > { %s656_s19 = scalar_select %p36_p7, %s574_s8, %s38_s15  }
  0x10   : > { %p658_p11 = por %p83_p10, %p51_p3  ;;  %99 = sbr.rel (%p812_p12) target bundleno = 58 (0x3a), region = 16 }
  0x12   : > { %s815_s20 = scalar_select %p658_p11, 1, 0 }
  0x17   : > { %102 = sbr.rel (!%p47_p4) target bundleno = 58 (0x3a), region = 20  ;;  %s103_s21 = sand.u32 (%p47_p4), 1, %s574_s8  }
  0x18   : > { %s108_s22 = smul.u32 (%p47_p4), 3, %s582_s10  ;;  %s670_s27 = scalar_lea.sflag (%p47_p4), [#allocation3], %s103_s21 }
  0x19   : > { %s403_s23 = smul.u32 (%p47_p4), 24, %s103_s21 }
  0x1a   : > { %s110_s24 = ssub.s32 (%p47_p4), 5, %s108_s22 }
  0x1b   : > { %p111_p13 = scmp.lt.s32.totalorder (%p47_p4), %s110_s24, 3  ;;  %s107_s28 = scalar_lea.vmem (%p47_p4), [#allocation2], %s403_s23 }
  0x1e   : > { %s826_s24 = smov (!%p111_p13, %s110_s24), 3 }
  0x1f   : > { %s667_s25 = sshll.u32 %s826_s24, 7 }
  0x20   : > { %s116_s26 = ssub.s32 384, %s667_s25 }
  0x21   : > { %117 = vsyncadd %s670_s27, %s116_s26  ;;  %p380_p0 = scmp.ne.s32.totalorder %s667_s25, 0  ;;  %s401_s29 = smul.u32 384, %s582_s10 }
  0x22   : > { %s124_s30 = sshll.u32 %s107_s28, 4  ;;  %s480_s15 = scalar_lea.hbm %s810_s0, 640  ;;  %s680_s30 = int_to_ptr.vmem [resolvable:$true] %s124_s30 }
  0x23   : > { %s678_s4 = scalar_lea.hbm %s810_s0, %s401_s29 }
  0x24   : > { %s476_s5 = scalar_lea.hbm %s678_s4, %s667_s25  ;;  %p481_p4 = scmp.lt.u32.totalorder %s678_s4, %s810_s0 }
  0x25   : > { %p477_p1 = scmp.ne.s32.totalorder %s678_s4, %s476_s5  ;;  %p482_p5 = scmp.lt.u32.totalorder %s480_s15, %s476_s5 }
  0x26   : > { %p484_p7 = scmp.lt.u32.totalorder %s476_s5, %s678_s4 }
  0x27   : > { %p478_p2 = pnand %p477_p1, %p380_p0  ;;  %p483_p6 = por %p482_p5, %p481_p4 }
  0x29   : > { %p479_p3 = pneg %p478_p2  ;;  %p485_p10 = por %p484_p7, %p483_p6 }
  0x2b   : > { %p486_p13 = pnand %p485_p10, %p479_p3 }
  0x2d   : > { %489 = shalt.err (!%p486_p13)
}
  0x2e   : > { %s490_s22 = scalar_lea.vmem %s680_s30, %s667_s25  ;;  %s588_s23 = smov [#allocation2]  }
  0x2f   : > { %p491_p1 = scmp.ne.s32.totalorder %s680_s30, %s490_s22  ;;  %s494_s24 = sshll.u32 %s588_s23, 4  ;;  %s495_s24 = int_to_ptr.vmem [resolvable:$false] %s494_s24 }
  0x30   : > { %s496_s26 = scalar_lea.vmem %s495_s24, 768  ;;  %p497_p11 = scmp.lt.s32.totalorder %s680_s30, %s495_s24 }
  0x31   : > { %p492_p2 = pnand %p491_p1, %p380_p0  ;;  %p498_p4 = scmp.lt.s32.totalorder %s496_s26, %s490_s22 }
  0x33   : > { %p493_p12 = pneg %p492_p2  ;;  %p499_p5 = por %p498_p4, %p497_p11 }
  0x35   : > { %p500_p6 = pnand %p499_p5, %p493_p12 }
  0x37   : > { %503 = shalt.err (!%p500_p6)
}
  0x38   : > { %s589_s28 = smov 128   ;;  %s590_s29 = smov 8  }
  0x39   : > { %130 = dma.hbm_to_vmem [thread:$0]  (%p380_p0), %s678_s4, %s667_s25, %s680_s30, %s670_s27, %s589_s28, %s589_s28, %s590_s29  }
  0x3a PF: > { %p385_p3 = scmp.ge.s32.totalorder %s586_s11, 1  ;;  %p132_p7 = scmp.lt.s32.totalorder %s586_s11, 3 }
  0x3c   : > { %p133_p10 = pnand %p385_p3, %p132_p7 }
  0x3d   : > { %s710_s2 = sand.u32 (!%p133_p10), 1, %s570_s7  }
  0x3e   : > { %136 = sbr.rel (%p133_p10) target bundleno = 137 (0x89), region = 24  ;;  %s139_s5 = scalar_lea.sflag (!%p133_p10), [#allocation3], %s710_s2 }
  0x3f   : > { %s404_s3 = smul.u32 (!%p133_p10), 24, %s710_s2 }
  0x41   : > { %s142_s12 = scalar_lea.vmem (!%p133_p10), [#allocation2], %s404_s3 }
  0x45   : > { %557 = dma.done.wait (%p647_p8), %s139_s5, 384  }
  0x46   : > { %559 = vsyncadd (%p647_p8), %s139_s5, 4294966912  ;;  %v720_v0 = vld [vmem:[%s142_s12] sm:$0xff]  ;;  %vm190_vm0 = vcmask 1043456   ;;  %v722_v1 = vld [vmem:[%s142_s12 + $0x8] sm:$0xff]  ;;  %s160_s17 = scalar_lea.vmem [#allocation5], %s404_s3  ;;  %s264_s25 = scalar_lea.sflag [#allocation4], %s710_s2 }
  0x47   : > { %v724_v2 = vld [vmem:[%s142_s12 + $0x10] sm:$0xff]  ;;  %v178_v3 = vmul.f32 %v720_v0, %v720_v0  ;;  %v179_v4 = vmul.f32 %v722_v1, %v722_v1  ;;  %s271_s27 = smul.u32 (%p651_p9), 3, %s578_s9 }
  0x48   : > { %v180_v5 = vmul.f32 %v724_v2, %v724_v2 }
  0x49   : > { %v184_v6 = vcombine.high %v178_v3, %v178_v3  ;;  %v191_v7 = vsel %vm190_vm0, %v178_v3, 0.0  ;;  %v185_v8 = vcombine.high %v179_v4, %v179_v4  ;;  %v205_v9 = vsel %vm190_vm0, %v179_v4, 0.0  ;;  %s273_s30 = ssub.s32 (%p651_p9), 5, %s271_s27 }
  0x4a   : > { %v192_v10 = vrot.slane %v191_v7, 4  ;;  %v206_v11 = vrot.slane %v205_v9, 4  ;;  %v186_v12 = vcombine.high %v180_v5, %v180_v5  ;;  %v219_v13 = vsel %vm190_vm0, %v180_v5, 0.0  ;;  %p274_p8 = scmp.lt.s32.totalorder (%p651_p9), %s273_s30, 3 }
  0x4b   : > { %v198_v14 = vsel %vm190_vm0, %v184_v6, 0.0  ;;  %v212_v15 = vsel %vm190_vm0, %v185_v8, 0.0  ;;  %v220_v16 = vrot.slane %v219_v13, 4 }
  0x4c   : > { %v193_v17 = vadd.f32 %v192_v10, %v191_v7  ;;  %v199_v18 = vrot.slane %v198_v14, 4  ;;  %v207_v19 = vadd.f32 %v206_v11, %v205_v9  ;;  %v213_v20 = vrot.slane %v212_v15, 4 }
  0x4d   : > { %v221_v21 = vadd.f32 %v220_v16, %v219_v13  ;;  %v226_v22 = vsel %vm190_vm0, %v186_v12, 0.0 }
  0x4e   : > { %v194_v23 = vrot.slane %v193_v17, 2  ;;  %v200_v24 = vadd.f32 %v199_v18, %v198_v14  ;;  %v208_v25 = vrot.slane %v207_v19, 2  ;;  %v214_v26 = vadd.f32 %v213_v20, %v212_v15 }
  0x4f   : > { %v222_v27 = vrot.slane %v221_v21, 2  ;;  %v227_v28 = vrot.slane %v226_v22, 4 }
  0x50   : > { %v195_v29 = vadd.f32 %v194_v23, %v193_v17  ;;  %v201_v30 = vrot.slane %v200_v24, 2  ;;  %v209_v31 = vadd.f32 %v208_v25, %v207_v19  ;;  %v215_v32 = vrot.slane %v214_v26, 2 }
  0x51   : > { %v223_v33 = vadd.f32 %v222_v27, %v221_v21  ;;  %v228_v34 = vadd.f32 %v227_v28, %v226_v22 }
  0x52   : > { %v196_v35 = vrot.slane %v195_v29, 1  ;;  %v202_v36 = vadd.f32 %v201_v30, %v200_v24  ;;  %v210_v37 = vrot.slane %v209_v31, 1  ;;  %v216_v38 = vadd.f32 %v215_v32, %v214_v26 }
  0x53   : > { %v224_v39 = vrot.slane %v223_v33, 1  ;;  %v229_v40 = vrot.slane %v228_v34, 2 }
  0x54   : > { %v197_v41 = vadd.f32 %v196_v35, %v195_v29  ;;  %v203_v42 = vrot.slane %v202_v36, 1  ;;  %v211_v43 = vadd.f32 %v210_v37, %v209_v31  ;;  %v217_v44 = vrot.slane %v216_v38, 1 }
  0x55   : > { %v225_v45 = vadd.f32 %v224_v39, %v223_v33  ;;  %v230_v46 = vadd.f32 %v229_v40, %v228_v34 }
  0x56   : > { %v204_v47 = vadd.f32 %v203_v42, %v202_v36  ;;  %v233_v48 = vmax.f32 %v197_v41, 1e-24  ;;  %v218_v49 = vadd.f32 %v217_v44, %v216_v38  ;;  %v235_v50 = vmax.f32 %v211_v43, 1e-24 }
  0x57   : > { %v231_v51 = vrot.slane %v230_v46, 1  ;;  %v237_v54 = vmax.f32 %v225_v45, 1e-24 }
  0x58   : > { %v234_v52 = vmax.f32 %v204_v47, 1e-24  ;;  %464 = vrsqrt.f32 %v233_v48  ;;  %v236_v53 = vmax.f32 %v218_v49, 1e-24 }
  0x59   : > { %466 = vrsqrt.f32 %v235_v50  ;;  %v232_v55 = vadd.f32 %v231_v51, %v230_v46 }
  0x5a   : > { %468 = vrsqrt.f32 %v234_v52 }
  0x5b   : > { %470 = vrsqrt.f32 %v236_v53  ;;  %v238_v56 = vmax.f32 %v232_v55, 1e-24 }
  0x5c   : > { %472 = vrsqrt.f32 %v237_v54 }
  0x5d   : > { %474 = vrsqrt.f32 %v238_v56 }
  0x62   : > { %v465_v57 = vpop.eup %464 }
  0x63   : > { %v467_v58 = vpop.eup %466 }
  0x64   : > { %v469_v59 = vpop.eup %468 }
  0x65   : > { %v471_v60 = vpop.eup %470  ;;  %v251_v61 = vcombine.low %v465_v57, %v469_v59 }
  0x66   : > { %v473_v62 = vpop.eup %472  ;;  %v252_v63 = vcombine.low %v467_v58, %v471_v60  ;;  %270 = sbr.rel (!%p651_p9) target bundleno = 137 (0x89), region = 32 }
  0x67   : > { %v475_v3 = vpop.eup %474  ;;  %v257_v4 = vmul.f32 %v251_v61, %v720_v0 }
  0x68   : > { %v258_v5 = vmul.f32 %v252_v63, %v722_v1  ;;  %v253_v6 = vcombine.low %v473_v62, %v475_v3 }
  0x69   : > { %260 = vst [vmem:[%s160_s17] sm:$0xff] %v257_v4 }
  0x6a   : > { %261 = vst [vmem:[%s160_s17 + $0x8] sm:$0xff] %v258_v5  ;;  %v259_v7 = vmul.f32 %v253_v6, %v724_v2 }
  0x6c   : > { %262 = vst [vmem:[%s160_s17 + $0x10] sm:$0xff] %v259_v7 }
  0x6d   : > { %s828_s30 = smov (!%p274_p8, %s273_s30), 3 }
  0x6e   : > { %s747_s4 = sshll.u32 %s828_s30, 7 }
  0x6f   : > { %s279_s13 = ssub.s32 384, %s747_s4 }
  0x70   : > { %280 = vsyncadd %s264_s25, %s279_s13  ;;  %p388_p11 = scmp.ne.s32.totalorder %s747_s4, 0  ;;  %s402_s15 = smul.u32 384, %s578_s9 }
  0x71   : > { %s287_s18 = sshll.u32 %s160_s17, 4  ;;  %s591_s24 = smov [#allocation5]   ;;  %s759_s18 = int_to_ptr.vmem [resolvable:$true] %s287_s18 }
  0x72   : > { %s757_s22 = scalar_lea.hbm %s811_s1, %s402_s15  ;;  %s504_s23 = scalar_lea.vmem %s759_s18, %s747_s4 }
  0x73   : > { %p505_p9 = scmp.ne.s32.totalorder %s759_s18, %s504_s23  ;;  %s508_s26 = sshll.u32 %s591_s24, 4  ;;  %s509_s26 = int_to_ptr.vmem [resolvable:$false] %s508_s26 }
  0x74   : > { %s510_s9 = scalar_lea.vmem %s509_s26, 768  ;;  %p511_p13 = scmp.lt.s32.totalorder %s759_s18, %s509_s26 }
  0x75   : > { %p506_p12 = pnand %p505_p9, %p388_p11  ;;  %p512_p1 = scmp.lt.s32.totalorder %s510_s9, %s504_s23 }
  0x77   : > { %p507_p0 = pneg %p506_p12  ;;  %p513_p2 = por %p512_p1, %p511_p13 }
  0x79   : > { %p514_p4 = pnand %p513_p2, %p507_p0 }
  0x7b   : > { %517 = shalt.err (!%p514_p4)
}
  0x7c   : > { %s518_s28 = scalar_lea.hbm %s757_s22, %s747_s4  ;;  %s522_s5 = scalar_lea.hbm %s811_s1, 640 }
  0x7d   : > { %p519_p5 = scmp.ne.s32.totalorder %s757_s22, %s518_s28  ;;  %p523_p7 = scmp.lt.u32.totalorder %s757_s22, %s811_s1 }
  0x7e   : > { %p524_p10 = scmp.lt.u32.totalorder %s522_s5, %s518_s28  ;;  %p526_p9 = scmp.lt.u32.totalorder %s518_s28, %s757_s22 }
  0x7f   : > { %p520_p6 = pnand %p519_p5, %p388_p11 }
  0x80   : > { %p525_p8 = por %p524_p10, %p523_p7 }
  0x81   : > { %p521_p3 = pneg %p520_p6 }
  0x82   : > { %p527_p12 = por %p526_p9, %p525_p8 }
  0x84   : > { %p528_p0 = pnand %p527_p12, %p521_p3 }
  0x86   : > { %531 = shalt.err (!%p528_p0)
}
  0x87   : > { %s592_s27 = smov 128   ;;  %s593_s30 = smov 8  }
  0x88   : > { %293 = dma.vmem_to_hbm [thread:$0]  (%p388_p11), %s759_s18, %s747_s4, %s757_s22, %s264_s25, %s592_s27, %s592_s27, %s593_s30  }
  0x89 PF: > { %s302_s13 = sand.u32 1, %s566_s6   ;;  %p816_p13 = scmp.ne.s32.totalorder %s815_s20, 0 }
  0x8a   : > { %p817_p1 = scmp.ge.s32.totalorder %s586_s11, 2  ;;  %s303_s15 = scalar_lea.sflag [#allocation4], %s302_s13 }
  0x8c   : > { %p408_p2 = pnand %p817_p1, %p816_p13 }
  0x8e   : > { %561 = dma.done.wait (!%p408_p2), %s303_s15, 384  }
  0x8f   : > { %563 = vsyncadd (!%p408_p2), %s303_s15, 4294966912  ;;  %s17_s11 = sadd.s32 1, %s586_s11   ;;  %s818_s6 = smov %s570_s7 }
  0x90   : > { %p14_p4 = scmp.ge.s32.totalorder %s17_s11, 4   ;;  %s819_s7 = smov %s574_s8 }
  0x91   : > { %s820_s8 = smov %s656_s19  ;;  %s821_s9 = smov %s582_s10 }
  0x92   : > { %s822_s10 = smov %s824_s14  ;;  %16 = sbr.rel (!%p14_p4) target bundleno = 6 (0x6), region = 69 }
  0x99   :  { %308 = vsyncpa [#allocation3], 1 }
  0x9a   :  { %310 = vsyncpa [#allocation3 + $0x1], 1 }
  0x9b   :  { %311 = vsyncpa [#allocation4], 1 }
  0x9c   :  { %313 = vsyncpa [#allocation4 + $0x1], 1 }

</bundles_post_ra>
